<compile_context>
chip_gen: v5e
topology: v5e:2x2
jax: 0.10.0
libtpu: 0.0.40
codegen_flags: <defaults>
</compile_context>

<pallas_src>
import functools
import math

import jax
import jax.numpy as jnp
from jax.experimental import pallas as pl
from jax.experimental.pallas import tpu as pltpu


def _layer1_kernel(adj_ref, s1_ref, b1_ref, w2_ref, s2_ref, acc_ref):
    """Grid (i, k): acc += A[i,k] @ S1[k]; on last k:
    h = relu(acc + b1);  S2[i] = (h @ W2)  stored bf16."""
    k = pl.program_id(1)

    @pl.when(k == 0)
    def _():
        acc_ref[...] = jnp.zeros_like(acc_ref)

    acc_ref[...] += jnp.dot(adj_ref[...], s1_ref[...],
                            preferred_element_type=jnp.float32)

    @pl.when(k == pl.num_programs(1) - 1)
    def _():
        h = jnp.maximum(acc_ref[...] + b1_ref[...], 0.0)        # bias+ReLU, f32
        # (dropout skipped: eval mode)
        s2 = jnp.dot(h.astype(w2_ref.dtype), w2_ref[...],
                     preferred_element_type=jnp.float32)
        s2_ref[...] = s2.astype(s2_ref.dtype)


def _layer2_kernel(adj_ref, s2_ref, b2_ref, out_ref, acc_ref, *, n_cls):
    """Grid (i, k): acc += A[i,k] @ S2[k]; on last k:
    z = acc + b2; mask padded class lanes; out[i] = log_softmax(z)."""
    k = pl.program_id(1)

    @pl.when(k == 0)
    def _():
        acc_ref[...] = jnp.zeros_like(acc_ref)

    acc_ref[...] += jnp.dot(adj_ref[...], s2_ref[...],
                            preferred_element_type=jnp.float32)

    @pl.when(k == pl.num_programs(1) - 1)
    def _():
        z = acc_ref[...] + b2_ref[...]
        col = jax.lax.broadcasted_iota(jnp.int32, z.shape, 1)
        z = jnp.where(col < n_cls, z, -1e30)       # mask padded class columns
        z_max = jnp.max(z, axis=1, keepdims=True)
        z_shift = z - z_max
        lse = jnp.log(jnp.sum(jnp.exp(z_shift), axis=1, keepdims=True))
        out_ref[...] = (z_shift - lse).astype(out_ref.dtype)


def gcn_forward(x, adj, w1, b1, w2, b2, *, tile_m=256, tile_k=256):
    n, _ = x.shape
    hid = w1.shape[1]
    n_cls = w2.shape[1]

    # Pad node dim to a multiple of both tile sizes (padded adj rows/cols are
    # zero, real nodes unaffected, padded output rows sliced off).  Pad the
    # class dim to 128 lanes for lane-dense stores.
    blk = math.lcm(tile_m, tile_k)
    n_pad = -(-n // blk) * blk
    cls_pad = -(-n_cls // 128) * 128

    # Layer-1 feature transform hoisted out of the kernel; bf16 MXU operand.
    support1 = jnp.dot(x.astype(jnp.float32),
                       w1.astype(jnp.float32)).astype(jnp.bfloat16)

    if n_pad != n:
        support1 = jnp.pad(support1, ((0, n_pad - n), (0, 0)))
        adj = jnp.pad(adj, ((0, n_pad - n), (0, n_pad - n)))
    adj_bf16 = adj.astype(jnp.bfloat16)          # halves the dominant HBM stream

    b1_r = jnp.reshape(b1, (1, hid)).astype(jnp.float32)
    w2_p = jnp.pad(w2.astype(jnp.bfloat16), ((0, 0), (0, cls_pad - n_cls)))
    b2_p = jnp.pad(jnp.reshape(b2, (1, n_cls)).astype(jnp.float32),
                   ((0, 0), (0, cls_pad - n_cls)))

    grid = (n_pad // tile_m, n_pad // tile_k)

    def const2d(shape):
        return pl.BlockSpec(shape, lambda i, k: (0, 0))

    # -------- call 1: support2 = relu(A @ support1 + b1) @ W2  (bf16) --------
    support2 = pl.pallas_call(
        _layer1_kernel,
        out_shape=jax.ShapeDtypeStruct((n_pad, cls_pad), jnp.bfloat16),
        grid_spec=pltpu.PrefetchScalarGridSpec(
            num_scalar_prefetch=0,
            grid=grid,
            in_specs=[
                pl.BlockSpec((tile_m, tile_k), lambda i, k: (i, k)),  # adj tile
                pl.BlockSpec((tile_k, hid), lambda i, k: (k, 0)),     # support1
                const2d((1, hid)),                                    # b1
                const2d((hid, cls_pad)),                              # W2
            ],
            out_specs=pl.BlockSpec((tile_m, cls_pad), lambda i, k: (i, 0)),
            scratch_shapes=[pltpu.VMEM((tile_m, hid), jnp.float32)],  # f32 acc
        ),
        compiler_params=pltpu.CompilerParams(
            dimension_semantics=("parallel", "arbitrary")),
    )(adj_bf16, support1, b1_r, w2_p)

    # -------- call 2: out = log_softmax(A @ support2 + b2) -------------------
    out = pl.pallas_call(
        functools.partial(_layer2_kernel, n_cls=n_cls),
        out_shape=jax.ShapeDtypeStruct((n_pad, cls_pad), jnp.float32),
        grid_spec=pltpu.PrefetchScalarGridSpec(
            num_scalar_prefetch=0,
            grid=grid,
            in_specs=[
                pl.BlockSpec((tile_m, tile_k), lambda i, k: (i, k)),   # adj tile
                pl.BlockSpec((tile_k, cls_pad), lambda i, k: (k, 0)),  # support2
                const2d((1, cls_pad)),                                 # b2
            ],
            out_specs=pl.BlockSpec((tile_m, cls_pad), lambda i, k: (i, 0)),
            scratch_shapes=[pltpu.VMEM((tile_m, cls_pad), jnp.float32)],
        ),
        compiler_params=pltpu.CompilerParams(
            dimension_semantics=("parallel", "arbitrary")),
    )(adj_bf16, support2, b2_p)

    return out[:n, :n_cls]


def reference_forward(x, adj, w1, b1, w2, b2):
    h = jnp.maximum(adj @ (x @ w1) + b1, 0.0)
    z = adj @ (h @ w2) + b2
    return jax.nn.log_softmax(z, axis=1)


def reference_forward_bf16(x, adj, w1, b1, w2, b2):
    # Mirrors the kernel's mixed precision: bf16 MXU operands, f32 accumulate,
    # f32 elementwise / log_softmax.
    adj_b = adj.astype(jnp.bfloat16)
    s1 = (x @ w1).astype(jnp.bfloat16)
    h = jnp.maximum(
        jnp.dot(adj_b, s1, preferred_element_type=jnp.float32) + b1, 0.0)
    s2 = jnp.dot(h.astype(jnp.bfloat16), w2.astype(jnp.bfloat16),
                 preferred_element_type=jnp.float32).astype(jnp.bfloat16)
    z = jnp.dot(adj_b, s2, preferred_element_type=jnp.float32) + b2
    return jax.nn.log_softmax(z, axis=1)


if __name__ == "__main__":
    # Small graph: N nodes (non-multiple of the tile to exercise padding),
    # indim -> hiddim -> classdim.
    N, indim, hiddim, classdim = 300, 64, 32, 16

    key = jax.random.PRNGKey(0)
    k_x, k_a, k_w1, k_b1, k_w2, k_b2 = jax.random.split(key, 6)

    x = jax.random.normal(k_x, (N, indim), dtype=jnp.float32)

    # Symmetric, self-looped, row-normalized dense adjacency.
    a_raw = (jax.random.uniform(k_a, (N, N)) > 0.9).astype(jnp.float32)
    a_sym = jnp.maximum(a_raw, a_raw.T) + jnp.eye(N, dtype=jnp.float32)
    adj = a_sym / jnp.sum(a_sym, axis=1, keepdims=True)

    def uinit(k, shape, fan):
        bound = 1.0 / jnp.sqrt(fan)
        return jax.random.uniform(k, shape, minval=-bound, maxval=bound,
                                  dtype=jnp.float32)

    w1 = uinit(k_w1, (indim, hiddim), indim)
    b1 = uinit(k_b1, (1, hiddim), indim)
    w2 = uinit(k_w2, (hiddim, classdim), hiddim)
    b2 = uinit(k_b2, (1, classdim), hiddim)

    out = gcn_forward(x, adj, w1, b1, w2, b2, tile_m=128, tile_k=128)
    out = jax.block_until_ready(out)
    assert out.shape == (N, classdim)

    ref_bf16 = reference_forward_bf16(x, adj, w1, b1, w2, b2)
    ref_f32 = reference_forward(x, adj, w1, b1, w2, b2)

    assert jnp.allclose(out, ref_bf16, atol=1e-2, rtol=1e-2), \
        "mismatch vs bf16-matched reference"
    assert jnp.allclose(out, ref_f32, atol=3e-2, rtol=3e-2), \
        "mismatch vs f32 reference"

    print("KERNEL_OK")
</pallas_src>

<mosaic_0001>
module attributes {stable_mosaic.version = 11 : i64} {
  func.func @_layer1_kernel(%arg0: i32, %arg1: i32, %arg2: memref<128x128xbf16, #tpu.memory_space<vmem>>, %arg3: memref<128x32xbf16, #tpu.memory_space<vmem>>, %arg4: memref<1x32xf32, #tpu.memory_space<vmem>>, %arg5: memref<32x128xbf16, #tpu.memory_space<vmem>>, %arg6: memref<128x128xbf16, #tpu.memory_space<vmem>>, %arg7: memref<128x32xf32, #tpu.memory_space<vmem>>) attributes {dimension_semantics = [#tpu.dimension_semantics<parallel>, #tpu.dimension_semantics<arbitrary>], iteration_bounds = array<i64: 3, 3>, scalar_prefetch = 0 : i64, scratch_operands = 1 : i64, tpu.core_type = #tpu.core_type<tc>, window_params = [{transform_indices = @transform_0, window_bounds = array<i64: 128, 128>}, {transform_indices = @transform_1, window_bounds = array<i64: 128, 32>}, {pipeline_mode = #tpu.pipeline_mode<synchronous>, transform_indices = @transform_2, window_bounds = array<i64: 1, 32>}, {pipeline_mode = #tpu.pipeline_mode<synchronous>, transform_indices = @transform_3, window_bounds = array<i64: 32, 128>}, {transform_indices = @transform_4, window_bounds = array<i64: 128, 128>}]} {
    %c0_i32 = arith.constant 0 : i32
    %0 = arith.cmpi eq, %arg1, %c0_i32 : i32
    %1 = arith.extui %0 : i1 to i32
    %c0_i32_0 = arith.constant 0 : i32
    %2 = arith.cmpi ne, %1, %c0_i32_0 : i32
    scf.if %2 {
      %cst_9 = arith.constant 0.000000e+00 : f32
      %12 = vector.broadcast %cst_9 : f32 to vector<128x32xf32>
      %c0_10 = arith.constant 0 : index
      %c0_11 = arith.constant 0 : index
      %13 = vector.load %arg7[%c0_10, %c0_11] : memref<128x32xf32, #tpu.memory_space<vmem>>, vector<128x32xf32>
      tpu.vector_store %arg7[%c0_10, %c0_11], %12 {strides = array<i32>} : memref<128x32xf32, #tpu.memory_space<vmem>>, vector<128x32xf32>,
    } else {
    }
    %c0 = arith.constant 0 : index
    %c0_1 = arith.constant 0 : index
    %3 = vector.load %arg7[%c0, %c0_1] : memref<128x32xf32, #tpu.memory_space<vmem>>, vector<128x32xf32>
    %c0_2 = arith.constant 0 : index
    %c0_3 = arith.constant 0 : index
    %4 = vector.load %arg2[%c0_2, %c0_3] : memref<128x128xbf16, #tpu.memory_space<vmem>>, vector<128x128xbf16>
    %c0_4 = arith.constant 0 : index
    %c0_5 = arith.constant 0 : index
    %5 = vector.load %arg3[%c0_4, %c0_5] : memref<128x32xbf16, #tpu.memory_space<vmem>>, vector<128x32xbf16>
    %cst = arith.constant dense<0.000000e+00> : vector<128x32xf32>
    %6 = tpu.matmul %4, %5, %cst {dimension_numbers = #tpu.dot_dimension_numbers<[1], [0], [0], [1], [0, 0, 1, 1], [], []>} : vector<128x128xbf16>, vector<128x32xbf16>, vector<128x32xf32> -> vector<128x32xf32>
    %7 = arith.addf %3, %6 : vector<128x32xf32>
    %c0_6 = arith.constant 0 : index
    %c0_7 = arith.constant 0 : index
    %8 = vector.load %arg7[%c0_6, %c0_7] : memref<128x32xf32, #tpu.memory_space<vmem>>, vector<128x32xf32>
    tpu.vector_store %arg7[%c0_6, %c0_7], %7 {strides = array<i32>} : memref<128x32xf32, #tpu.memory_space<vmem>>, vector<128x32xf32>,
    %c2_i32 = arith.constant 2 : i32
    %9 = arith.cmpi eq, %arg1, %c2_i32 : i32
    %10 = arith.extui %9 : i1 to i32
    %c0_i32_8 = arith.constant 0 : i32
    %11 = arith.cmpi ne, %10, %c0_i32_8 : i32
    scf.if %11 {
      %c0_9 = arith.constant 0 : index
      %c0_10 = arith.constant 0 : index
      %12 = vector.load %arg7[%c0_9, %c0_10] : memref<128x32xf32, #tpu.memory_space<vmem>>, vector<128x32xf32>
      %c0_11 = arith.constant 0 : index
      %c0_12 = arith.constant 0 : index
      %13 = vector.load %arg4[%c0_11, %c0_12] : memref<1x32xf32, #tpu.memory_space<vmem>>, vector<1x32xf32>
      %14 = vector.broadcast %13 : vector<1x32xf32> to vector<128x32xf32>
      %15 = arith.addf %12, %14 : vector<128x32xf32>
      %cst_13 = arith.constant 0.000000e+00 : f32
      %16 = vector.broadcast %cst_13 : f32 to vector<128x32xf32>
      %17 = arith.maximumf %15, %16 : vector<128x32xf32>
      %18 = arith.truncf %17 : vector<128x32xf32> to vector<128x32xbf16>
      %c0_14 = arith.constant 0 : index
      %c0_15 = arith.constant 0 : index
      %19 = vector.load %arg5[%c0_14, %c0_15] : memref<32x128xbf16, #tpu.memory_space<vmem>>, vector<32x128xbf16>
      %cst_16 = arith.constant dense<0.000000e+00> : vector<128x128xf32>
      %20 = tpu.matmul %18, %19, %cst_16 {dimension_numbers = #tpu.dot_dimension_numbers<[1], [0], [0], [1], [0, 0, 1, 1], [], []>} : vector<128x32xbf16>, vector<32x128xbf16>, vector<128x128xf32> -> vector<128x128xf32>
      %21 = arith.truncf %20 : vector<128x128xf32> to vector<128x128xbf16>
      %c0_17 = arith.constant 0 : index
      %c0_18 = arith.constant 0 : index
      %22 = vector.load %arg6[%c0_17, %c0_18] : memref<128x128xbf16, #tpu.memory_space<vmem>>, vector<128x128xbf16>
      tpu.vector_store %arg6[%c0_17, %c0_18], %21 {strides = array<i32>} : memref<128x128xbf16, #tpu.memory_space<vmem>>, vector<128x128xbf16>,
    } else {
    }
    return
  }
  func.func @transform_0(%arg0: i32, %arg1: i32) -> (i32, i32) {
    %c0_i32 = arith.constant 0 : i32
    return %arg0, %arg1 : i32, i32
  }
  func.func @transform_1(%arg0: i32, %arg1: i32) -> (i32, i32) {
    %c0_i32 = arith.constant 0 : i32
    %c0_i32_0 = arith.constant 0 : i32
    return %arg1, %c0_i32 : i32, i32
  }
  func.func @transform_2(%arg0: i32, %arg1: i32) -> (i32, i32) {
    %c0_i32 = arith.constant 0 : i32
    %c0_i32_0 = arith.constant 0 : i32
    %c0_i32_1 = arith.constant 0 : i32
    return %c0_i32, %c0_i32_0 : i32, i32
  }
  func.func @transform_3(%arg0: i32, %arg1: i32) -> (i32, i32) {
    %c0_i32 = arith.constant 0 : i32
    %c0_i32_0 = arith.constant 0 : i32
    %c0_i32_1 = arith.constant 0 : i32
    return %c0_i32, %c0_i32_0 : i32, i32
  }
  func.func @transform_4(%arg0: i32, %arg1: i32) -> (i32, i32) {
    %c0_i32 = arith.constant 0 : i32
    %c0_i32_0 = arith.constant 0 : i32
    return %arg0, %c0_i32 : i32, i32
  }
}

</mosaic_0001>

<bundles_post_ra>
// kernel: tpu_custom_call.1
= control target key start
LH: loop header
LB: loop body
LE: loop exit
PB: predicated region body
PF: predicated region fallthrough
CT: control target
= control target key end

     0   :  { %9 = vsyncpa [#allocation4], 0  ;;  %s1552_s0 = inlined_call_operand.hbm [shape: bf16[384,384], index: 0, kind: input, shape index: {}]   ;;  %s1553_s1 = inlined_call_operand.vmem [shape: bf16[384,32], index: 1, kind: input, shape index: {}]   ;;  %s1554_s2 = inlined_call_operand.vmem [shape: f32[1,32], index: 2, kind: input, shape index: {}]   ;;  %s1555_s3 = inlined_call_operand.vmem [shape: bf16[32,128], index: 3, kind: input, shape index: {}]   ;;  %s1556_s4 = inlined_call_operand.hbm [shape: bf16[384,128], index: 4, kind: output, shape index: {}]  }
   0x1   :  { %11 = vsyncpa [#allocation4 + $0x1], 0 }
   0x2   :  { %12 = vsyncpa [#allocation5], 0 }
   0x3   :  { %14 = vsyncpa [#allocation5 + $0x1], 0  ;;  %s1296_s15 = smov 0   ;;  %s1298_s16 = smov 0  }
   0x4   :  { %s1300_s17 = smov 0   ;;  %s1302_s18 = smov 0  }
   0x5   :  { %s1304_s19 = smov 0   ;;  %s1306_s20 = smov 0  }
   0x6   :  { %s1308_s21 = smov 0   ;;  %s1310_s22 = smov 0  }
   0x7   :  { %s1312_s23 = smov 0   ;;  %s1314_s24 = smov 0  }
   0x8   :  { %s1316_s25 = smov 0  }
   0x9 LB: > { %1562 = sst [smem:[#allocation9_spill]] %s1231_s17  ;;  %s805_s26 = sadd.s32 4294967295, %s1263_s25   ;;  %s1263_s25 = sphi %s1316_s25, %s20_s25   ;;  %s1259_s24 = sphi %s1314_s24, %s1587_s24   ;;  %s1255_s23 = sphi %s1312_s23, %s1586_s23   ;;  %s1251_s22 = sphi %s1310_s22, %s1585_s22   ;;  %s1247_s21 = sphi %s1308_s21, %s1584_s21   ;;  %s1243_s20 = sphi %s1306_s20, %s1577_s20   ;;  %s1239_s19 = sphi %s1304_s19, %s1583_s19   ;;  %s1235_s18 = sphi %s1302_s18, %s1582_s18   ;;  %s1231_s17 = sphi %s1300_s17, %s1575_s17   ;;  %s1227_s16 = sphi %s1298_s16, %s1581_s16   ;;  %s1223_s15 = sphi %s1296_s15, %s1580_s15  }
   0xa   : > { %1563 = sst [smem:[#allocation10_spill]] %s1243_s20  ;;  %s806_s27 = sadd.s32 4294967294, %s1263_s25  }
   0xb   : > { %s29_s28 = sadd.s32 1, %s1255_s23  ;;  %s32_s29 = sadd.s32 1, %s1259_s24 }
   0xc   : > { %p30_p0 = scmp.ge.s32.totalorder %s29_s28, 3  ;;  %s41_s30 = sadd.s32 1, %s1243_s20 }
   0xd   : > { %p48_p1 = scmp.ne.s32.totalorder %s1243_s20, %s1239_s19  ;;  %p49_p2 = scmp.eq.s32.totalorder %s1263_s25, 0 }
   0xe   : > { %s1589_s28 = smov (%p30_p0, %s29_s28), 0  ;;  %s1591_s29 = smov (!%p30_p0, %s32_s29), %s1259_s24 }
   0xf   : > { %1564 = sst [smem:[#allocation11_spill]] %s1589_s28  ;;  %s37_s5 = ssub.s32 %s1255_s23, %s1589_s28 }
  0x10   : > { %p1362_p3 = por %p49_p2, %p48_p1  ;;  %p34_p4 = scmp.ge.s32.totalorder %s1591_s29, 3 }
  0x11   : > { %p54_p5 = scmp.ne.s32.totalorder %s1239_s19, %s1235_s18  ;;  %p55_p6 = scmp.eq.s32.totalorder %s805_s26, 0 }
  0x12   : > { %s135_s7 = sadd.s32 1, %s1231_s17  ;;  %s1593_s29 = smov (%p34_p4, %s1591_s29), 0 }
  0x13   : > { %1566 = sst [smem:[#allocation12_spill]] %s1593_s29  ;;  %p1370_p7 = por %p55_p6, %p54_p5 }
  0x14   : > { %p145_p8 = scmp.ne.s32.totalorder %s1231_s17, %s1227_s16  ;;  %s36_s9 = ssub.s32 %s1259_s24, %s1593_s29 }
  0x15   : > { %p146_p9 = scmp.eq.s32.totalorder %s805_s26, 8  ;;  %s38_s10 = sor.u32 %s37_s5, %s36_s9 }
  0x16   : > { %p133_p10 = scmp.eq.s32.totalorder %s36_s9, 0  ;;  %p39_p11 = scmp.eq.s32.totalorder %s38_s10, 0 }
  0x17   : > { %p1378_p12 = por %p146_p9, %p145_p8  ;;  %p151_p13 = scmp.ne.s32.totalorder %s1227_s16, %s1223_s15 }
  0x18   : > { %s1383_s12 = scalar_select %p133_p10, %s1231_s17, %s135_s7  }
  0x19   : > { %s1386_s13 = scalar_select %p39_p11, %s1243_s20, %s41_s30  }
  0x1a   : > { %1569 = sst [smem:[#allocation13_spill]] %s1383_s12  ;;  %p152_p0 = scmp.eq.s32.totalorder %s806_s27, 8 }
  0x1b   : > { %1570 = sst [smem:[#allocation14_spill]] %s1386_s13  ;;  %p1014_p1 = scmp.lt.s32.totalorder %s1263_s25, 9 }
  0x1c   : > { %p1391_p2 = por %p152_p0, %p151_p13  ;;  %s178_s18 = sand.u32 1, %s1243_s20  }
  0x1d   : > { %s809_s26 = sshll.u32 %s178_s18, 6  ;;  %s1001_s5 = smul.u32 48, %s1259_s24 }
  0x1e   : > { %s1571_s14 = scalar_select %p1391_p2, 1, 0 }
  0x1f   : > { %s182_s9 = scalar_lea.vmem [#allocation3], %s809_s26  ;;  %p1007_p4 = pnand %p1014_p1, %p1362_p3 }
  0x20   : > { %1572 = sst [smem:[#allocation15_spill]] %s1571_s14  ;;  %s192_s10 = sshll.u32 %s182_s9, 4  ;;  %s193_s10 = int_to_ptr.vmem [resolvable:$true] %s192_s10 }
  0x21   : > { %s187_s7 = sadd.s32 %s1255_s23, %s1001_s5  ;;  %s179_s12 = scalar_lea.sflag [#allocation4], %s178_s18 }
  0x22   : > { %s812_s30 = sshll.u32 %s187_s7, 2  ;;  %s1265_s17 = smov 192  }
  0x23   : > { %s189_s27 = scalar_lea.hbm %s1552_s0, %s812_s30  ;;  %s1266_s20 = smov 64  }
  0x24   : > { %s190_s13 = sshll.u32 %s189_s27, 4  ;;  %s1267_s14 = smov 4   ;;  %s191_s13 = int_to_ptr.hbm [resolvable:$true] %s190_s13 }
  0x25   : > { %1009 = dma.hbm_to_vmem [thread:$0]  (!%p1007_p4), %s191_s13, 1024, %s193_s10, %s179_s12, %s1265_s17, %s1266_s20, %s1267_s14  }
  0x26   : > { %p813_p5 = scmp.ge.s32.totalorder %s1263_s25, 1  ;;  %p209_p6 = scmp.lt.s32.totalorder %s1263_s25, 10 }
  0x28   : > { %p210_p8 = pnand %p813_p5, %p209_p6 }
  0x29   : > { %s215_s6 = sand.u32 (!%p210_p8), 1, %s1239_s19  }
  0x2a   : > { %213 = sbr.rel (%p210_p8) target bundleno = 454 (0x1c6), region = 36  ;;  %s814_s26 = sshll.u32 (!%p210_p8), %s215_s6, 6 }
  0x2b   : > { %s216_s5 = scalar_lea.sflag (!%p210_p8), [#allocation4], %s215_s6  ;;  %s1406_s9 = scalar_lea.vmem (!%p210_p8), [#allocation3], %s814_s26 }
  0x2f   : > { %1214 = dma.done.wait (%p1370_p7), %s216_s5, 1024  }
  0x30   : > { %1216 = vsyncadd (%p1370_p7), %s216_s5, 4294966272  ;;  %s247_s17 = sand.u32 1, %s1227_s16   ;;  %s816_s20 = sshll.u32 %s1247_s21, 4 }
  0x31   : > { %s815_s28 = sshll.u32 %s247_s17, 6  ;;  %p252_p3 = scmp.lt.s32.totalorder %s816_s20, 47 }
  0x32   : > { %s1421_s18 = scalar_lea.vmem [#allocation6], %s815_s28  ;;  %p818_p9 = scmp.ne.s32.totalorder %s1247_s21, 0 }
  0x33   : > { %s1595_s20 = smov (!%p252_p3, %s816_s20), 47 }
  0x34   : > { %s817_s29 = sshll.u32 %s1595_s20, 2  ;;  %262 = sbr.rel (%p818_p9) target bundleno = 74 (0x4a), region = 44 }
  0x35   : > { %s1419_s14 = scalar_lea.vmem %s1553_s1, %s817_s29 }
  0x39   : > { %vm263_vm0 = vcmask 261120   ;;  %v1268_v0 = vmov 0.0  }
  0x3a   : > { %264 = vst.msk [vmem:[#allocation2] sm:$0xff] %vm263_vm0, %v1268_v0 }
  0x3b   : > { %265 = vst.msk [vmem:[#allocation2 + $0x8] sm:$0xff] %vm263_vm0, %v1268_v0 }
  0x3c   : > { %266 = vst.msk [vmem:[#allocation2 + $0x10] sm:$0xff] %vm263_vm0, %v1268_v0 }
  0x3d   : > { %267 = vst.msk [vmem:[#allocation2 + $0x18] sm:$0xff] %vm263_vm0, %v1268_v0 }
  0x3e   : > { %268 = vst.msk [vmem:[#allocation2 + $0x20] sm:$0xff] %vm263_vm0, %v1268_v0 }
  0x3f   : > { %269 = vst.msk [vmem:[#allocation2 + $0x28] sm:$0xff] %vm263_vm0, %v1268_v0 }
  0x40   : > { %270 = vst.msk [vmem:[#allocation2 + $0x30] sm:$0xff] %vm263_vm0, %v1268_v0 }
  0x41   : > { %271 = vst.msk [vmem:[#allocation2 + $0x38] sm:$0xff] %vm263_vm0, %v1268_v0 }
  0x42   : > { %272 = vst.msk [vmem:[#allocation2 + $0x40] sm:$0xff] %vm263_vm0, %v1268_v0 }
  0x43   : > { %273 = vst.msk [vmem:[#allocation2 + $0x48] sm:$0xff] %vm263_vm0, %v1268_v0 }
  0x44   : > { %274 = vst.msk [vmem:[#allocation2 + $0x50] sm:$0xff] %vm263_vm0, %v1268_v0 }
  0x45   : > { %275 = vst.msk [vmem:[#allocation2 + $0x58] sm:$0xff] %vm263_vm0, %v1268_v0 }
  0x46   : > { %276 = vst.msk [vmem:[#allocation2 + $0x60] sm:$0xff] %vm263_vm0, %v1268_v0 }
  0x47   : > { %277 = vst.msk [vmem:[#allocation2 + $0x68] sm:$0xff] %vm263_vm0, %v1268_v0 }
  0x48   : > { %278 = vst.msk [vmem:[#allocation2 + $0x70] sm:$0xff] %vm263_vm0, %v1268_v0 }
  0x49   : > { %279 = vst.msk [vmem:[#allocation2 + $0x78] sm:$0xff] %vm263_vm0, %v1268_v0 }
  0x4a PF: > { %v920_v1 = vld [vmem:[%s1419_s14 + $0x38] sm:$0xff]  ;;  %v919_v2 = vld [vmem:[%s1419_s14 + $0x30] sm:$0xff]  ;;  %v918_v3 = vld [vmem:[%s1419_s14 + $0x28] sm:$0xff]  ;;  %vm489_vm1 = vcmask 261120   ;;  %p883_p7 = scmp.ne.s32.totalorder %s1247_s21, 2 }
  0x4b   : > { %424 = vmatpush.bf16.msra.mxu0 %v920_v1  ;;  %971 = vmatpush.bf16.msra.mxu1 %v920_v1  ;;  %v917_v4 = vld [vmem:[%s1419_s14 + $0x20] sm:$0xff]  ;;  %v916_v5 = vld [vmem:[%s1419_s14 + $0x18] sm:$0xff]  ;;  %v915_v6 = vld [vmem:[%s1419_s14 + $0x10] sm:$0xff] }
  0x4c   : > { %972 = vmatpush.bf16.msra.mxu2 %v920_v1  ;;  %973 = vmatpush.bf16.msra.mxu3 %v920_v1  ;;  %v914_v7 = vld [vmem:[%s1419_s14 + $0x8] sm:$0xff]  ;;  %v913_v8 = vld [vmem:[%s1419_s14] sm:$0xff]  ;;  %v907_v10 = vld [vmem:[%s1406_s9 + $0x10] sm:$0xff] }
  0x4d   : > { %v905_v9 = vld [vmem:[%s1406_s9] sm:$0xff]  ;;  %v911_v12 = vld [vmem:[%s1406_s9 + $0x30] sm:$0xff]  ;;  %v906_v13 = vld [vmem:[%s1406_s9 + $0x8] sm:$0xff] }
  0x4e   : > { %v909_v11 = vld [vmem:[%s1406_s9 + $0x20] sm:$0xff]  ;;  %v908_v14 = vld [vmem:[%s1406_s9 + $0x18] sm:$0xff]  ;;  %v910_v15 = vld [vmem:[%s1406_s9 + $0x28] sm:$0xff] }
  0x4f   : > { %425 = vmatpush.bf16.msra.mxu0 %v919_v2  ;;  %974 = vmatpush.bf16.msra.mxu1 %v919_v2  ;;  %v912_v16 = vld [vmem:[%s1406_s9 + $0x38] sm:$0xff]  ;;  %v280_v17 = vld [vmem:[#allocation2] sm:$0xff]  ;;  %v281_v25 = vld [vmem:[#allocation2 + $0x8] sm:$0xff] }
  0x50   : > { %975 = vmatpush.bf16.msra.mxu2 %v919_v2  ;;  %976 = vmatpush.bf16.msra.mxu3 %v919_v2  ;;  %v284_v18 = vld [vmem:[#allocation2 + $0x20] sm:$0xff]  ;;  %v285_v26 = vld [vmem:[#allocation2 + $0x28] sm:$0xff]  ;;  %v282_v37 = vld [vmem:[#allocation2 + $0x10] sm:$0xff] }
  0x51   : > { %v288_v23 = vld [vmem:[#allocation2 + $0x40] sm:$0xff]  ;;  %v289_v35 = vld [vmem:[#allocation2 + $0x48] sm:$0xff]  ;;  %v286_v38 = vld [vmem:[#allocation2 + $0x30] sm:$0xff] }
  0x52   : > { %v292_v24 = vld [vmem:[#allocation2 + $0x60] sm:$0xff]  ;;  %v293_v36 = vld [vmem:[#allocation2 + $0x68] sm:$0xff]  ;;  %v290_v47 = vld [vmem:[#allocation2 + $0x50] sm:$0xff] }
  0x53   : > { %426 = vmatpush.bf16.msra.mxu0 %v918_v3  ;;  %977 = vmatpush.bf16.msra.mxu1 %v918_v3  ;;  %v294_v48 = vld [vmem:[#allocation2 + $0x70] sm:$0xff]  ;;  %v283_v49 = vld [vmem:[#allocation2 + $0x18] sm:$0xff] }
  0x54   : > { %978 = vmatpush.bf16.msra.mxu2 %v918_v3  ;;  %979 = vmatpush.bf16.msra.mxu3 %v918_v3  ;;  %v287_v50 = vld [vmem:[#allocation2 + $0x38] sm:$0xff] }
  0x55   : > { %v291_v59 = vld [vmem:[#allocation2 + $0x58] sm:$0xff] }
  0x56   : > { %v295_v60 = vld [vmem:[#allocation2 + $0x78] sm:$0xff] }
  0x57   : > { %427 = vmatpush.bf16.msra.mxu0 %v917_v4  ;;  %980 = vmatpush.bf16.msra.mxu1 %v917_v4 }
  0x58   : > { %981 = vmatpush.bf16.msra.mxu2 %v917_v4  ;;  %982 = vmatpush.bf16.msra.mxu3 %v917_v4 }
  0x5b   : > { %428 = vmatpush.bf16.msra.mxu0 %v916_v5  ;;  %983 = vmatpush.bf16.msra.mxu1 %v916_v5 }
  0x5c   : > { %984 = vmatpush.bf16.msra.mxu2 %v916_v5  ;;  %985 = vmatpush.bf16.msra.mxu3 %v916_v5 }
  0x5f   : > { %429 = vmatpush.bf16.msra.mxu0 %v915_v6  ;;  %986 = vmatpush.bf16.msra.mxu1 %v915_v6 }
  0x60   : > { %987 = vmatpush.bf16.msra.mxu2 %v915_v6  ;;  %988 = vmatpush.bf16.msra.mxu3 %v915_v6 }
  0x63   : > { %430 = vmatpush.bf16.msra.mxu0 %v914_v7  ;;  %989 = vmatpush.bf16.msra.mxu1 %v914_v7 }
  0x64   : > { %990 = vmatpush.bf16.msra.mxu2 %v914_v7  ;;  %991 = vmatpush.bf16.msra.mxu3 %v914_v7 }
  0x67   : > { %431 = vmatpush.bf16.msra.mxu0 %v913_v8  ;;  %992 = vmatpush.bf16.msra.mxu1 %v913_v8 }
  0x68   : > { %993 = vmatpush.bf16.msra.mxu2 %v913_v8  ;;  %994 = vmatpush.bf16.msra.mxu3 %v913_v8 }
  0x6a   : > { %432 = vmatmul.bf16.vlgmr.msra.gmra.mxu0 %v905_v9  ;;  %442 = vmatmul.bf16.vlgmr.msra.gmra.mxu1 %v907_v10 }
  0x6b   : > { %452 = vmatmul.bf16.vlgmr.msra.gmra.mxu2 %v909_v11  ;;  %462 = vmatmul.bf16.vlgmr.msra.gmra.mxu3 %v911_v12 }
  0x7a   : > { %437 = vmatmul.bf16.gmra.mxu0 %v906_v13  ;;  %447 = vmatmul.bf16.gmra.mxu1 %v908_v14 }
  0x7b   : > { %457 = vmatmul.bf16.gmra.mxu2 %v910_v15  ;;  %467 = vmatmul.bf16.gmra.mxu3 %v912_v16 }
  0xe7   : > { %v433_v19 = vpop.f32.mrf.mxu0  ;;  %v443_v20 = vpop.f32.mrf.mxu1 }
  0xe8   : > { %v473_v21 = vadd.f32 %v433_v19, %v280_v17  ;;  %v477_v22 = vadd.f32 %v443_v20, %v284_v18 }
  0xea   : > { %490 = vst.msk [vmem:[#allocation2] sm:$0xff] %vm489_vm1, %v473_v21 }
  0xeb   : > { %494 = vst.msk [vmem:[#allocation2 + $0x20] sm:$0xff] %vm489_vm1, %v477_v22 }
  0xee   : > { %v453_v27 = vpop.f32.mrf.mxu2  ;;  %v463_v28 = vpop.f32.mrf.mxu3 }
  0xef   : > { %v481_v29 = vadd.f32 %v453_v27, %v288_v23  ;;  %v485_v30 = vadd.f32 %v463_v28, %v292_v24  ;;  %v435_v31 = vpop.f32.mrf.mxu0  ;;  %v445_v32 = vpop.f32.mrf.mxu1 }
  0xf0   : > { %v474_v33 = vadd.f32 %v435_v31, %v281_v25  ;;  %v478_v34 = vadd.f32 %v445_v32, %v285_v26 }
  0xf1   : > { %498 = vst.msk [vmem:[#allocation2 + $0x40] sm:$0xff] %vm489_vm1, %v481_v29 }
  0xf2   : > { %502 = vst.msk [vmem:[#allocation2 + $0x60] sm:$0xff] %vm489_vm1, %v485_v30 }
  0xf3   : > { %491 = vst.msk [vmem:[#allocation2 + $0x8] sm:$0xff] %vm489_vm1, %v474_v33 }
  0xf4   : > { %495 = vst.msk [vmem:[#allocation2 + $0x28] sm:$0xff] %vm489_vm1, %v478_v34 }
  0xf6   : > { %v455_v39 = vpop.f32.mrf.mxu2  ;;  %v465_v40 = vpop.f32.mrf.mxu3 }
  0xf7   : > { %v482_v41 = vadd.f32 %v455_v39, %v289_v35  ;;  %v486_v42 = vadd.f32 %v465_v40, %v293_v36  ;;  %v438_v43 = vpop.f32.mrf.mxu0  ;;  %v448_v44 = vpop.f32.mrf.mxu1 }
  0xf8   : > { %v475_v45 = vadd.f32 %v438_v43, %v282_v37  ;;  %v479_v46 = vadd.f32 %v448_v44, %v286_v38 }
  0xf9   : > { %499 = vst.msk [vmem:[#allocation2 + $0x48] sm:$0xff] %vm489_vm1, %v482_v41 }
  0xfa   : > { %503 = vst.msk [vmem:[#allocation2 + $0x68] sm:$0xff] %vm489_vm1, %v486_v42 }
  0xfb   : > { %492 = vst.msk [vmem:[#allocation2 + $0x10] sm:$0xff] %vm489_vm1, %v475_v45 }
  0xfc   : > { %496 = vst.msk [vmem:[#allocation2 + $0x30] sm:$0xff] %vm489_vm1, %v479_v46 }
  0xfe   : > { %v458_v51 = vpop.f32.mrf.mxu2  ;;  %v468_v52 = vpop.f32.mrf.mxu3 }
  0xff   : > { %v483_v53 = vadd.f32 %v458_v51, %v290_v47  ;;  %v487_v54 = vadd.f32 %v468_v52, %v294_v48  ;;  %v440_v55 = vpop.f32.mrf.mxu0  ;;  %v450_v56 = vpop.f32.mrf.mxu1 }
 0x100   : > { %v476_v57 = vadd.f32 %v440_v55, %v283_v49  ;;  %v480_v58 = vadd.f32 %v450_v56, %v287_v50 }
 0x101   : > { %500 = vst.msk [vmem:[#allocation2 + $0x50] sm:$0xff] %vm489_vm1, %v483_v53 }
 0x102   : > { %504 = vst.msk [vmem:[#allocation2 + $0x70] sm:$0xff] %vm489_vm1, %v487_v54 }
 0x103   : > { %493 = vst.msk [vmem:[#allocation2 + $0x18] sm:$0xff] %vm489_vm1, %v476_v57 }
 0x104   : > { %497 = vst.msk [vmem:[#allocation2 + $0x38] sm:$0xff] %vm489_vm1, %v480_v58 }
 0x106   : > { %v460_v61 = vpop.f32.mrf.mxu2  ;;  %v470_v62 = vpop.f32.mrf.mxu3  ;;  %509 = sbr.rel (%p883_p7) target bundleno = 438 (0x1b6), region = 48 }
 0x107   : > { %v484_v63 = vadd.f32 %v460_v61, %v291_v59  ;;  %v488_v0 = vadd.f32 %v470_v62, %v295_v60 }
 0x109   : > { %501 = vst.msk [vmem:[#allocation2 + $0x58] sm:$0xff] %vm489_vm1, %v484_v63 }
 0x10a   : > { %505 = vst.msk [vmem:[#allocation2 + $0x78] sm:$0xff] %vm489_vm1, %v488_v0 }
 0x10b   : > { %v922_v1 = vld [vmem:[%s1555_s3 + $0x8] sm:$0xff]  ;;  %v921_v2 = vld [vmem:[%s1555_s3] sm:$0xff]  ;;  %v512_v32 = vld [vmem:[#allocation2 + $0x10] sm:$0xff] }
 0x10c   : > { %v510_v3 = vld [vmem:[#allocation2] sm:$0xff]  ;;  %v511_v4 = vld [vmem:[#allocation2 + $0x8] sm:$0xff]  ;;  %616 = vmatpush.bf16.msra.mxu0 %v922_v1  ;;  %995 = vmatpush.bf16.msra.mxu1 %v922_v1  ;;  %v513_v33 = vld [vmem:[#allocation2 + $0x18] sm:$0xff] }
 0x10d   : > { %v1110_v5 = vld [vmem:[%s1554_s2] ss:$0 sm:$0xff]  ;;  %v515_v7 = vld [vmem:[#allocation2 + $0x28] sm:$0xff]  ;;  %996 = vmatpush.bf16.msra.mxu2 %v922_v1  ;;  %997 = vmatpush.bf16.msra.mxu3 %v922_v1  ;;  %v516_v34 = vld [vmem:[#allocation2 + $0x30] sm:$0xff] }
 0x10e   : > { %v514_v6 = vld [vmem:[#allocation2 + $0x20] sm:$0xff]  ;;  %v530_v9 = vadd.f32 %v1110_v5, %v510_v3  ;;  %v531_v10 = vadd.f32 %v1110_v5, %v511_v4  ;;  %v519_v12 = vld [vmem:[#allocation2 + $0x48] sm:$0xff]  ;;  %v535_v15 = vadd.f32 %v1110_v5, %v515_v7  ;;  %v517_v35 = vld [vmem:[#allocation2 + $0x38] sm:$0xff]  ;;  %v532_v40 = vadd.f32 %v1110_v5, %v512_v32 }
 0x10f   : > { %v518_v8 = vld [vmem:[#allocation2 + $0x40] sm:$0xff]  ;;  %v534_v11 = vadd.f32 %v1110_v5, %v514_v6  ;;  %v523_v14 = vld [vmem:[#allocation2 + $0x68] sm:$0xff]  ;;  %v539_v17 = vadd.f32 %v1110_v5, %v519_v12  ;;  %v520_v36 = vld [vmem:[#allocation2 + $0x50] sm:$0xff]  ;;  %v533_v41 = vadd.f32 %v1110_v5, %v513_v33  ;;  %v536_v42 = vadd.f32 %v1110_v5, %v516_v34 }
 0x110   : > { %v522_v13 = vld [vmem:[#allocation2 + $0x60] sm:$0xff]  ;;  %v538_v16 = vadd.f32 %v1110_v5, %v518_v8  ;;  %v546_v19 = vmax.f32 %v530_v9, 0.0  ;;  %v547_v20 = vmax.f32 %v531_v10, 0.0  ;;  %v543_v22 = vadd.f32 %v1110_v5, %v523_v14  ;;  %617 = vmatpush.bf16.msra.mxu0 %v921_v2  ;;  %998 = vmatpush.bf16.msra.mxu1 %v921_v2  ;;  %v521_v37 = vld [vmem:[#allocation2 + $0x58] sm:$0xff]  ;;  %v524_v38 = vld [vmem:[#allocation2 + $0x70] sm:$0xff] }
 0x111   : > { %v542_v18 = vadd.f32 %v1110_v5, %v522_v13  ;;  %v550_v21 = vmax.f32 %v534_v11, 0.0  ;;  %v551_v23 = vmax.f32 %v535_v15, 0.0  ;;  %v555_v25 = vmax.f32 %v539_v17, 0.0  ;;  %999 = vmatpush.bf16.msra.mxu2 %v921_v2  ;;  %1000 = vmatpush.bf16.msra.mxu3 %v921_v2  ;;  %v525_v39 = vld [vmem:[#allocation2 + $0x78] sm:$0xff] }
 0x112   : > { %v554_v24 = vmax.f32 %v538_v16, 0.0  ;;  %v562_v27 = vpack.c.bf16 %v547_v20, %v546_v19  ;;  %v559_v28 = vmax.f32 %v543_v22, 0.0  ;;  %v537_v43 = vadd.f32 %v1110_v5, %v517_v35 }
 0x113   : > { %v558_v26 = vmax.f32 %v542_v18, 0.0  ;;  %v564_v29 = vpack.c.bf16 %v551_v23, %v550_v21  ;;  %v540_v44 = vadd.f32 %v1110_v5, %v520_v36  ;;  %v541_v45 = vadd.f32 %v1110_v5, %v521_v37 }
 0x114   : > { %v566_v30 = vpack.c.bf16 %v555_v25, %v554_v24  ;;  %892 = vmatmul.msk.bf16.vlgmr.msra.gmra.mxu0 %vm489_vm1, %v562_v27  ;;  %v544_v46 = vadd.f32 %v1110_v5, %v524_v38  ;;  %v545_v47 = vadd.f32 %v1110_v5, %v525_v39  ;;  %v548_v48 = vmax.f32 %v532_v40, 0.0 }
 0x115   : > { %v568_v31 = vpack.c.bf16 %v559_v28, %v558_v26  ;;  %894 = vmatmul.msk.bf16.vlgmr.msra.gmra.mxu1 %vm489_vm1, %v564_v29  ;;  %v549_v49 = vmax.f32 %v533_v41, 0.0  ;;  %v552_v50 = vmax.f32 %v536_v42, 0.0  ;;  %v553_v51 = vmax.f32 %v537_v43, 0.0 }
 0x116   : > { %896 = vmatmul.msk.bf16.vlgmr.msra.gmra.mxu2 %vm489_vm1, %v566_v30  ;;  %v556_v52 = vmax.f32 %v540_v44, 0.0  ;;  %v557_v53 = vmax.f32 %v541_v45, 0.0  ;;  %v560_v54 = vmax.f32 %v544_v46, 0.0  ;;  %v561_v55 = vmax.f32 %v545_v47, 0.0 }
 0x117   : > { %898 = vmatmul.msk.bf16.vlgmr.msra.gmra.mxu3 %vm489_vm1, %v568_v31  ;;  %v563_v56 = vpack.c.bf16 %v549_v49, %v548_v48  ;;  %v565_v57 = vpack.c.bf16 %v553_v51, %v552_v50 }
 0x118   : > { %v567_v58 = vpack.c.bf16 %v557_v53, %v556_v52  ;;  %v569_v59 = vpack.c.bf16 %v561_v55, %v560_v54 }
 0x124   : > { %893 = vmatmul.msk.bf16.gmra.mxu0 %vm489_vm1, %v563_v56 }
 0x125   : > { %895 = vmatmul.msk.bf16.gmra.mxu1 %vm489_vm1, %v565_v57 }
 0x126   : > { %897 = vmatmul.msk.bf16.gmra.mxu2 %vm489_vm1, %v567_v58 }
 0x127   : > { %899 = vmatmul.msk.bf16.gmra.mxu3 %vm489_vm1, %v569_v59 }
 0x191   : > { %v619_v60 = vpop.f32.mrf.mxu0 }
 0x192   : > { %v629_v61 = vpop.f32.mrf.mxu1 }
 0x199   : > { %v639_v62 = vpop.f32.mrf.mxu2  ;;  %v621_v0 = vpop.f32.mrf.mxu0 }
 0x19a   : > { %v649_v63 = vpop.f32.mrf.mxu3  ;;  %v927_v1 = vpack.c.bf16 %v621_v0, %v619_v60  ;;  %v631_v2 = vpop.f32.mrf.mxu1 }
 0x19b   : > { %v937_v3 = vpack.c.bf16 %v631_v2, %v629_v61 }
 0x19c   : > { %928 = vst [vmem:[%s1421_s18] sm:$0xff] %v927_v1  }
 0x19d   : > { %965 = vst [vmem:[%s1421_s18 + $0x10] sm:$0xff] %v937_v3  }
 0x1a1   : > { %v641_v4 = vpop.f32.mrf.mxu2  ;;  %v624_v7 = vpop.f32.mrf.mxu0 }
 0x1a2   : > { %v947_v5 = vpack.c.bf16 %v641_v4, %v639_v62  ;;  %v651_v6 = vpop.f32.mrf.mxu3  ;;  %v634_v9 = vpop.f32.mrf.mxu1 }
 0x1a3   : > { %v957_v8 = vpack.c.bf16 %v651_v6, %v649_v63 }
 0x1a4   : > { %967 = vst [vmem:[%s1421_s18 + $0x20] sm:$0xff] %v947_v5  }
 0x1a5   : > { %969 = vst [vmem:[%s1421_s18 + $0x30] sm:$0xff] %v957_v8  }
 0x1a9   : > { %v644_v10 = vpop.f32.mrf.mxu2  ;;  %v626_v12 = vpop.f32.mrf.mxu0 }
 0x1aa   : > { %v654_v11 = vpop.f32.mrf.mxu3  ;;  %v932_v13 = vpack.c.bf16 %v626_v12, %v624_v7  ;;  %v636_v14 = vpop.f32.mrf.mxu1 }
 0x1ab   : > { %v942_v15 = vpack.c.bf16 %v636_v14, %v634_v9 }
 0x1ac   : > { %964 = vst [vmem:[%s1421_s18 + $0x8] sm:$0xff] %v932_v13  }
 0x1ad   : > { %966 = vst [vmem:[%s1421_s18 + $0x18] sm:$0xff] %v942_v15  }
 0x1b1   : > { %v646_v16 = vpop.f32.mrf.mxu2 }
 0x1b2   : > { %v952_v17 = vpack.c.bf16 %v646_v16, %v644_v10  ;;  %v656_v18 = vpop.f32.mrf.mxu3 }
 0x1b3   : > { %v962_v19 = vpack.c.bf16 %v656_v18, %v654_v11 }
 0x1b4   : > { %968 = vst [vmem:[%s1421_s18 + $0x28] sm:$0xff] %v952_v17  }
 0x1b5   : > { %970 = vst [vmem:[%s1421_s18 + $0x38] sm:$0xff] %v962_v19  }
 0x1b6 PF: > { %s923_s21 = sshll.u32 %s1251_s22, 6  ;;  %s704_s20 = sshll.u32 %s1421_s18, 4  ;;  %s705_s20 = int_to_ptr.vmem [resolvable:$true] %s704_s20 }
 0x1b7   : > { %s703_s9 = scalar_lea.hbm %s1556_s4, %s923_s21  ;;  %s692_s29 = scalar_lea.sflag [#allocation5], %s247_s17 }
 0x1b8   : > { %s706_s28 = sshll.u32 %s703_s9, 4  ;;  %s1161_s22 = scalar_lea.hbm %s1556_s4, 192  ;;  %s707_s28 = int_to_ptr.hbm [resolvable:$true] %s706_s28 }
 0x1b9   : > { %s1155_s12 = sshra.s32 %s707_s28, 4  ;;  %s1156_s12 = int_to_ptr.hbm [resolvable:$true] %s1155_s12 }
 0x1ba   : > { %s1157_s13 = scalar_lea.hbm %s1156_s12, 64  ;;  %p1162_p0 = scmp.lt.s32.totalorder %s1156_s12, %s1556_s4 }
 0x1bb   : > { %p1158_p10 = scmp.ne.s32.totalorder %s1156_s12, %s1157_s13  ;;  %p1163_p1 = scmp.lt.s32.totalorder %s1161_s22, %s1157_s13 }
 0x1bd   : > { %p1159_p11 = pnand %p1158_p10, %p1378_p12  ;;  %p1164_p4 = por %p1163_p1, %p1162_p0 }
 0x1bf   : > { %p1160_p13 = pneg %p1159_p11 }
 0x1c1   : > { %p1165_p5 = pnand %p1164_p4, %p1160_p13 }
 0x1c3   : > { %1168 = shalt.err (!%p1165_p5)
}
 0x1c4   : > { %s1269_s17 = smov 64   ;;  %s1270_s18 = smov 4  }
 0x1c5   : > { %1004 = dma.vmem_to_hbm [thread:$0]  (%p1378_p12), %s705_s20, 1024, %s707_s28, %s692_s29, %s1269_s17, %s1269_s17, %s1270_s18  }
 0x1c6 PF: > { %p1015_p6 = scmp.ge.s32.totalorder %s1263_s25, 2  ;;  %s721_s27 = sand.u32 1, %s1223_s15  }
 0x1c7   : > { %s722_s6 = scalar_lea.sflag [#allocation5], %s721_s27 }
 0x1c8   : > { %p1011_p8 = pnand %p1015_p6, %p1391_p2 }
 0x1ca   : > { %p1012_p3 = pneg %p1011_p8 }
 0x1cc   : > { %1218 = dma.done.wait (%p1012_p3), %s722_s6, 1024  }
 0x1cd   : > { %1220 = vsyncadd (%p1012_p3), %s722_s6, 4294966272  ;;  %s20_s25 = sadd.s32 1, %s1263_s25   ;;  %s1574_s21 = sld [smem:[#allocation9_spill]] }
 0x1ce   : > { %p17_p9 = scmp.ge.s32.totalorder %s20_s25, 11   ;;  %s1575_s17 = sld [smem:[#allocation13_spill]] }
 0x1cf   : > { %s1576_s11 = sld [smem:[#allocation10_spill]]  ;;  %s1580_s15 = smov %s1227_s16 }
 0x1d0   : > { %s1577_s20 = sld [smem:[#allocation14_spill]]  ;;  %s1582_s18 = smov %s1239_s19 }
 0x1d1   : > { %s1578_s26 = sld [smem:[#allocation11_spill]]  ;;  %s1585_s22 = smov %s1259_s24 }
 0x1d2   : > { %s1579_s5 = sld [smem:[#allocation12_spill]] }
 0x1d3   : > { %s1581_s16 = smov %s1574_s21  ;;  %s1584_s21 = smov %s1255_s23 }
 0x1d4   :  { %19 = sbr.rel (!%p17_p9) target bundleno = 9 (0x9), region = 92 }
 0x1d5   : > { %s1583_s19 = smov %s1576_s11 }
 0x1d7   : > { %s1586_s23 = smov %s1578_s26 }
 0x1d8   : > { %s1587_s24 = smov %s1579_s5 }
 0x1d9   :  { %728 = vsyncpa [#allocation4], 1 }
 0x1da   :  { %730 = vsyncpa [#allocation4 + $0x1], 1 }
 0x1db   :  { %731 = vsyncpa [#allocation5], 1 }
 0x1dc   :  { %733 = vsyncpa [#allocation5 + $0x1], 1 }

</bundles_post_ra>
